<compile_context>
chip_gen: v7x
topology: tpu7x:2x2x1
jax: 0.10.0
libtpu: 0.0.40
codegen_flags: <defaults>
</compile_context>

<pallas_src>
import math
from functools import partial

import jax
import jax.numpy as jnp
from jax.experimental import pallas as pl
from jax.experimental.pallas import tpu as pltpu

_LANE = 128


def _cdiv(a: int, b: int) -> int:
    return -(-a // b)


def _round_up(a: int, b: int) -> int:
    return _cdiv(a, b) * b


def _learnable_bias_kernel(x_ref, b_ref, o_ref, *, acc_dtype):
    # x_ref: (tm, tn), b_ref: (1, tn) broadcast over rows, o_ref: (tm, tn).
    x = x_ref[...].astype(acc_dtype)
    b = b_ref[...].astype(acc_dtype)
    o_ref[...] = (x + b).astype(o_ref.dtype)


def _tpu_budgets():
    """Generation-aware (per-tile bytes, VMEM capacity bytes)."""
    vmem_cap = 128 * 1024 * 1024  # v5e / v6e physical VMEM per TensorCore
    try:
        info = pltpu.get_tpu_info()
        cap = int(getattr(info, "vmem_capacity_bytes", 0) or 0)
        if cap > 0:
            vmem_cap = cap
    except Exception:
        pass
    # Per-(tm, tn) tile budget: 1/8 of VMEM, clamped to [4, 16] MiB.
    #   v5e/v6e (128 MiB) -> 16 MiB tiles, v7x (64 MiB/TC) -> 8 MiB tiles.
    # Working set ~= 4x tile (x + out, each double-buffered by the pipeline).
    tile_bytes = max(4 * 1024 * 1024, min(16 * 1024 * 1024, vmem_cap // 8))
    return tile_bytes, vmem_cap


def _largest_lane_divisor(hid_eff: int, max_lanes: int) -> int:
    """Largest divisor of hid_eff that is a multiple of 128 and <= max_lanes."""
    c = hid_eff // _LANE
    best = _LANE
    d = 1
    while d * d <= c:
        if c % d == 0:
            for dd in (d, c // d):
                cand = dd * _LANE
                if best < cand <= max_lanes:
                    best = cand
        d += 1
    return best


def learnable_bias(x: jax.Array, bias: jax.Array, *, donate_input: bool = False) -> jax.Array:
    """out = x + bias (bias of shape (C,) broadcast over the last dim of x)."""
    hidden = x.shape[-1]
    assert bias.shape == (hidden,), "bias must match the last dim of x"
    orig_shape = x.shape
    dtype = x.dtype
    itemsize = jnp.dtype(dtype).itemsize
    sublane = max(8, 32 // itemsize)  # 8 f32, 16 bf16, 32 int8/fp8
    is_float = jnp.issubdtype(dtype, jnp.floating)
    acc_dtype = jnp.float32 if is_float else dtype
    bias = bias.astype(jnp.float32 if is_float else dtype)

    tile_bytes, vmem_cap = _tpu_budgets()

    rows = int(math.prod(orig_shape[:-1]))

    # --- lane-density fold: make the last dim a multiple of 128 when possible.
    fold = 1
    if hidden % _LANE != 0:
        k = _LANE // math.gcd(hidden, _LANE)  # lcm(hidden,128) // hidden
        if rows % k == 0:
            fold = k
        # else: pad/split would materialize an extra HBM round trip (worse than
        # the masked partial stores of the ragged fallback), so fall through.
    rows_eff = rows // fold
    hid_eff = hidden * fold
    x2d = x.reshape(rows_eff, hid_eff)  # pure row-major view reshape
    bias_row = (jnp.tile(bias, fold) if fold > 1 else bias).reshape(1, hid_eff)

    # --- lane tile: prefer the full row; otherwise a multiple-of-128 divisor.
    if hid_eff % _LANE == 0:
        max_lanes = max(_LANE, tile_bytes // (sublane * itemsize))
        tn = hid_eff if hid_eff <= max_lanes else _largest_lane_divisor(hid_eff, max_lanes)
    else:
        tn = hid_eff  # ragged last dim: full-dim block is the only legal choice
    n_hid = hid_eff // tn  # tn always divides hid_eff -> no ragged lane block

    # --- row tile: largest multiple of the dtype's sublane packing within budget.
    if rows_eff <= sublane:
        tm = rows_eff  # block equal to full dim is legal
    else:
        tm_budget = max(sublane, (tile_bytes // (tn * itemsize)) // sublane * sublane)
        tm = max(sublane, min(tm_budget, (rows_eff // sublane) * sublane))
    n_row = _cdiv(rows_eff, tm)

    # --- v7x: keep the row axis splittable/balanced across 2 TensorCores.
    if rows_eff > sublane:
        if n_row == 1 and rows_eff >= 2 * sublane:
            tm = _round_up(_cdiv(rows_eff, 2), sublane)
            n_row = _cdiv(rows_eff, tm)
        elif n_row > 1 and n_row % 2 == 1:
            tm = _round_up(_cdiv(rows_eff, n_row + 1), sublane)
            n_row = _cdiv(rows_eff, tm)

    # --- grid: put the larger "parallel" axis first (megacore sharding).
    if n_hid > n_row:
        grid = (n_hid, n_row)
        x_spec = pl.BlockSpec((tm, tn), lambda j, i: (i, j))
        b_spec = pl.BlockSpec((1, tn), lambda j, i: (0, j))
        o_spec = pl.BlockSpec((tm, tn), lambda j, i: (i, j))
    else:
        grid = (n_row, n_hid)
        x_spec = pl.BlockSpec((tm, tn), lambda i, j: (i, j))
        b_spec = pl.BlockSpec((1, tn), lambda i, j: (0, j))
        o_spec = pl.BlockSpec((tm, tn), lambda i, j: (i, j))

    # --- scoped VMEM: double-buffered x + out tiles, plus bias and headroom.
    tile_actual = tm * tn * itemsize
    vmem_limit = 4 * tile_actual + 2 * hid_eff * 4 + (4 << 20)
    vmem_limit = int(min(max(vmem_limit, 16 << 20), vmem_cap * 3 // 4))

    extra = {}
    if donate_input:
        extra["input_output_aliases"] = {0: 0}

    out2d = pl.pallas_call(
        partial(_learnable_bias_kernel, acc_dtype=acc_dtype),
        out_shape=jax.ShapeDtypeStruct((rows_eff, hid_eff), dtype),
        grid_spec=pltpu.PrefetchScalarGridSpec(
            num_scalar_prefetch=0,
            grid=grid,
            in_specs=[x_spec, b_spec],
            out_specs=o_spec,
        ),
        compiler_params=pltpu.CompilerParams(
            dimension_semantics=("parallel", "parallel"),
            vmem_limit_bytes=vmem_limit,
        ),
        **extra,
    )(x2d, bias_row)

    return out2d.reshape(orig_shape)


if __name__ == "__main__":
    key = jax.random.PRNGKey(0)
    batch, seq, hidden = 2, 8, 32

    kx, kb = jax.random.split(key)
    x = jax.random.normal(kx, (batch, seq, hidden), dtype=jnp.float32)
    # PyTorch inits the bias to zeros; use nonzero values so the add is exercised.
    bias = jax.random.normal(kb, (hidden,), dtype=jnp.float32) * 0.1

    out = jax.block_until_ready(learnable_bias(x, bias))

    ref = x + bias  # broadcast over last dim == bias.expand_as(x)
    assert out.shape == x.shape
    assert jnp.allclose(out, ref, atol=1e-6, rtol=1e-6), "mismatch vs reference"
    print("KERNEL_OK")
</pallas_src>

<mosaic_0001>
module attributes {stable_mosaic.version = 11 : i64} {
  func.func @_learnable_bias_kernel(%arg0: i32, %arg1: i32, %arg2: memref<4x128xf32, #tpu.memory_space<vmem>>, %arg3: memref<1x128xf32, #tpu.memory_space<vmem>>, %arg4: memref<4x128xf32, #tpu.memory_space<vmem>>) attributes {dimension_semantics = [#tpu.dimension_semantics<parallel>, #tpu.dimension_semantics<parallel>], iteration_bounds = array<i64: 1, 1>, scalar_prefetch = 0 : i64, scratch_operands = 0 : i64, tpu.core_type = #tpu.core_type<tc>, window_params = [{transform_indices = @transform_0, window_bounds = array<i64: 4, 128>}, {transform_indices = @transform_1, window_bounds = array<i64: 1, 128>}, {transform_indices = @transform_2, window_bounds = array<i64: 4, 128>}]} {
    %c0 = arith.constant 0 : index
    %c0_0 = arith.constant 0 : index
    %0 = vector.load %arg2[%c0, %c0_0] : memref<4x128xf32, #tpu.memory_space<vmem>>, vector<4x128xf32>
    %c0_1 = arith.constant 0 : index
    %c0_2 = arith.constant 0 : index
    %1 = vector.load %arg3[%c0_1, %c0_2] : memref<1x128xf32, #tpu.memory_space<vmem>>, vector<1x128xf32>
    %2 = vector.broadcast %1 : vector<1x128xf32> to vector<4x128xf32>
    %3 = arith.addf %0, %2 : vector<4x128xf32>
    %c0_3 = arith.constant 0 : index
    %c0_4 = arith.constant 0 : index
    %4 = vector.load %arg4[%c0_3, %c0_4] : memref<4x128xf32, #tpu.memory_space<vmem>>, vector<4x128xf32>
    tpu.vector_store %arg4[%c0_3, %c0_4], %3 {strides = array<i32>} : memref<4x128xf32, #tpu.memory_space<vmem>>, vector<4x128xf32>,
    return
  }
  func.func @transform_0(%arg0: i32, %arg1: i32) -> (i32, i32) {
    %c0_i32 = arith.constant 0 : i32
    return %arg0, %arg1 : i32, i32
  }
  func.func @transform_1(%arg0: i32, %arg1: i32) -> (i32, i32) {
    %c0_i32 = arith.constant 0 : i32
    %c0_i32_0 = arith.constant 0 : i32
    return %c0_i32, %arg1 : i32, i32
  }
  func.func @transform_2(%arg0: i32, %arg1: i32) -> (i32, i32) {
    %c0_i32 = arith.constant 0 : i32
    return %arg0, %arg1 : i32, i32
  }
}

</mosaic_0001>

<bundles_post_ra>
// kernel: tpu_custom_call.1
= control target key start
LH: loop header
LB: loop body
LE: loop exit
PB: predicated region body
PF: predicated region fallthrough
CT: control target
= control target key end

     0   :  { %7 = vsyncpa [#allocation3], 0  ;;  %s144_s0 = inlined_call_operand.hbm [shape: f32[4,128], index: 0, kind: input, shape index: {}]   ;;  %s145_s1 = inlined_call_operand.vmem [shape: f32[1,128], index: 1, kind: input, shape index: {}]   ;;  %s146_s2 = inlined_call_operand.hbm [shape: f32[4,128], index: 2, kind: output, shape index: {}]  }
   0x1   :  { %8 = vsyncpa [#allocation4], 0  ;;  %s100_s9 = smov [#allocation2]   ;;  %s52_s13 = scalar_lea.hbm %s144_s0, 64 }
   0x2   :  { %s15_s10 = sshll.u32 %s100_s9, 4  ;;  %p53_p0 = scmp.ne.s32.totalorder %s144_s0, %s52_s13  ;;  %s16_s10 = int_to_ptr.vmem [resolvable:$true] %s15_s10 }
   0x3   :  { %p56_p1 = scmp.lt.u32.totalorder %s52_s13, %s144_s0 }
   0x5   :  { %p58_p2 = pnand %p56_p1, %p53_p0 }
   0x7   :  { %61 = shalt.err (!%p58_p2)
}
   0x8   :  { %s62_s18 = scalar_lea.vmem %s16_s10, 64  ;;  %p67_p4 = scmp.lt.s32.totalorder %s16_s10, %s16_s10 }
   0x9   :  { %p63_p3 = scmp.ne.s32.totalorder %s16_s10, %s62_s18  ;;  %p68_p5 = scmp.lt.s32.totalorder %s62_s18, %s62_s18 }
   0xb   :  { %p69_p6 = por %p68_p5, %p67_p4 }
   0xd   :  { %p70_p7 = pnand %p69_p6, %p63_p3 }
   0xf   :  { %73 = shalt.err (!%p70_p7)
}
  0x10   :  { %18 = dma.hbm_to_vmem [thread:$0]  %s144_s0, 64, %s16_s10, [#allocation3]  }
  0x11   :  { %96 = dma.done.wait [#allocation3], 64  }
  0x12   :  { %97 = vsyncadd [#allocation3], 4294967232  ;;  %s101_s21 = smov [#allocation5]   ;;  %v24_v0 = vld [vmem:[#allocation2] sm:$0xf] }
  0x13   :  { %s40_s22 = sshll.u32 %s101_s21, 4  ;;  %v49_v1 = vld [vmem:[%s145_s1] ss:$0 sm:$0xff]  ;;  %s41_s22 = int_to_ptr.vmem [resolvable:$true] %s40_s22 }
  0x14   :  { %v32_v2 = vadd.f32 %v49_v1, %v24_v0  ;;  %s74_s25 = scalar_lea.vmem %s41_s22, 64  ;;  %p79_p9 = scmp.lt.s32.totalorder %s41_s22, %s41_s22 }
  0x15   :  { %p75_p8 = scmp.ne.s32.totalorder %s41_s22, %s74_s25  ;;  %p80_p10 = scmp.lt.s32.totalorder %s74_s25, %s74_s25 }
  0x16   :  { %33 = vst [vmem:[#allocation5] sm:$0xf] %v32_v2 }
  0x17   :  { %p81_p11 = por %p80_p10, %p79_p9 }
  0x19   :  { %p82_p12 = pnand %p81_p11, %p75_p8 }
  0x1b   :  { %85 = shalt.err (!%p82_p12)
}
  0x1c   :  { %s86_s27 = scalar_lea.hbm %s146_s2, 64 }
  0x1d   :  { %p87_p13 = scmp.ne.s32.totalorder %s146_s2, %s86_s27  ;;  %p90_p0 = scmp.lt.u32.totalorder %s86_s27, %s146_s2 }
  0x1f   :  { %p92_p1 = pnand %p90_p0, %p87_p13 }
  0x21   :  { %95 = shalt.err (!%p92_p1)
}
  0x22   :  { %43 = dma.vmem_to_hbm [thread:$0]  %s41_s22, 64, %s146_s2, [#allocation4]  }
  0x23   :  { %98 = dma.done.wait [#allocation4], 64  }
  0x24   :  { %99 = vsyncadd [#allocation4], 4294967232 }
  0x25   :  { %47 = vsyncpa [#allocation3], 1 }
  0x26   :  { %48 = vsyncpa [#allocation4], 1 }

</bundles_post_ra>
